<compile_context>
chip_gen: v6e
topology: v6e:2x2x1
jax: 0.10.0
libtpu: 0.0.40
codegen_flags: <defaults>
</compile_context>

<pallas_src>
import functools
import numpy as np
import jax
import jax.numpy as jnp
from jax import lax
from jax.experimental import pallas as pl
from jax.experimental.pallas import tpu as pltpu


# ----------------------------------------------------------------------------
# Pallas kernel: per-(batch*class) spatial partial sums of y_true*y_pred and y_true+y_pred
# ----------------------------------------------------------------------------
def _dice_sums_kernel(yp_ref, yt_ref, prod_ref, plus_ref, *, ts, s_total, mask_tail):
    si = pl.program_id(1)  # spatial reduction axis (innermost, "arbitrary")

    @pl.when(si == 0)
    def _():
        prod_ref[...] = jnp.zeros_like(prod_ref)
        plus_ref[...] = jnp.zeros_like(plus_ref)

    # Native-dtype block load, upcast in-kernel; accumulation stays f32.
    a = yp_ref[...].astype(jnp.float32)          # (tr, ts)
    b = yt_ref[...].astype(jnp.float32)

    if mask_tail:
        # Ragged spatial tail: zero out lanes past the logical size S.
        lane = lax.broadcasted_iota(jnp.int32, a.shape, 1)
        valid = (si * ts + lane) < s_total
        a = jnp.where(valid, a, 0.0)
        b = jnp.where(valid, b, 0.0)

    prod_ref[...] += jnp.sum(a * b, axis=-1, keepdims=True)   # (tr, 1)
    plus_ref[...] += jnp.sum(a + b, axis=-1, keepdims=True)   # (tr, 1)


# ----------------------------------------------------------------------------
# Tile choosers
# ----------------------------------------------------------------------------
def _choose_row_tile(r, cap=64):
    """Largest multiple-of-8 divisor of r up to `cap`; falls back to the full dim."""
    if r <= 8 or r % 8 != 0:
        return r
    best, t = 8, 8
    while t <= min(r, cap):
        if r % t == 0:
            best = t
        t += 8
    return best


def _choose_spatial_tile(s, tr, itemsize, block_bytes):
    """Lane tile: full S if it fits the per-block budget, else a multiple of 128 under it."""
    cap = max(128, (block_bytes // (itemsize * tr)) // 128 * 128)
    if s <= cap:
        return s, False                 # one full-dim block per row tile, no mask needed
    return cap, (s % cap != 0)          # cdiv grid, mask the ragged tail if any


# ----------------------------------------------------------------------------
# Wrapper: Pallas reduction + tiny plain-JAX epilogue (weighting / reduction)
# ----------------------------------------------------------------------------
def soft_dice_loss(y_pred, y_true, weight=None, ignore_index=(), reduction="mean",
                   mode="dice", axis=1, eps=0.0, use_positive=False, block_bytes=2 << 20):
    """Matches SoftDiceLoss(...).forward(y_pred, y_true)."""
    assert y_pred.shape == y_true.shape
    assert axis == 1, "kernel assumes class axis == 1 (N, C, ...)"
    assert reduction in ("none", "mean", "sum")
    factor = {"iou": -1.0, "dice": 0.0}[mode]

    N, C = int(y_pred.shape[0]), int(y_pred.shape[1])
    S = int(np.prod(y_pred.shape[2:])) if y_pred.ndim > 2 else 1
    R = N * C

    # Contiguous metadata reshapes; NO dtype cast here (native dtype goes to the kernel).
    yp = y_pred.reshape(R, S)
    yt = y_true.reshape(R, S)

    tr = _choose_row_tile(R)
    itemsize = max(np.dtype(y_pred.dtype).itemsize, np.dtype(y_true.dtype).itemsize)
    ts, mask_tail = _choose_spatial_tile(S, tr, itemsize, block_bytes)
    grid = (R // tr, pl.cdiv(S, ts))

    kernel = functools.partial(_dice_sums_kernel, ts=ts, s_total=S, mask_tail=mask_tail)

    prod, plus = pl.pallas_call(
        kernel,
        out_shape=(jax.ShapeDtypeStruct((R, 1), jnp.float32),
                   jax.ShapeDtypeStruct((R, 1), jnp.float32)),
        grid=grid,
        in_specs=[
            pl.BlockSpec((tr, ts), lambda i, s: (i, s)),   # y_pred: rows on sublanes, spatial on lanes
            pl.BlockSpec((tr, ts), lambda i, s: (i, s)),   # y_true
        ],
        out_specs=(
            pl.BlockSpec((tr, 1), lambda i, s: (i, 0)),    # prod partials (resident accumulator)
            pl.BlockSpec((tr, 1), lambda i, s: (i, 0)),    # plus partials
        ),
        compiler_params=pltpu.CompilerParams(
            dimension_semantics=("parallel", "arbitrary"),  # rows parallel (v7x 2 TCs), spatial reduce
            vmem_limit_bytes=48 << 20),
    )(yp, yt)

    prod = prod.reshape(N, C)
    plus = plus.reshape(N, C)

    # ---- tiny O(N*C) epilogue in plain JAX (dice ratio, NaN/weight handling, reduction) ----
    iou = (2.0 + factor) * prod / (plus + factor * prod + eps)   # 0/0 -> NaN (torch parity)

    w = jnp.ones((C,), jnp.float32) if weight is None else jnp.asarray(weight, jnp.float32)
    keep_np = np.ones((C,), np.float32)
    if len(ignore_index):
        keep_np[np.asarray(list(ignore_index), dtype=np.int64)] = 0.0
    keep = jnp.asarray(keep_np)                                  # (C,)
    w_kept = w * keep

    not_nan = jnp.where(jnp.isnan(iou), 0.0, 1.0)                # (N, C)
    w_eff = not_nan * w_kept                                     # ignored / NaN columns -> weight 0
    w_sum = jnp.sum(w_eff, axis=-1, keepdims=True)               # (N, 1)
    x = jnp.where(keep > 0.0, iou, 0.0)                          # drop ignored columns entirely
    weighted = x * w_eff / w_sum                                 # NaN in kept columns propagates
    per_sample = jnp.sum(weighted, axis=-1)                      # (N,)

    if reduction == "none":
        res = -per_sample
    elif reduction == "mean":
        res = -jnp.mean(per_sample)
    else:
        res = -jnp.sum(per_sample)
    return res + 1.0 if use_positive else res


# ----------------------------------------------------------------------------
# Pure-JAX reference (direct transcription of the PyTorch module) for verification
# ----------------------------------------------------------------------------
def soft_dice_loss_ref(y_pred, y_true, weight=None, ignore_index=(), reduction="mean",
                       mode="dice", axis=1, eps=0.0, use_positive=False):
    factor = {"iou": -1.0, "dice": 0.0}[mode]
    sum_axis = tuple(list(range(1, axis)) + list(range(axis + 1, y_pred.ndim)))
    yp = y_pred.astype(jnp.float32)
    yt = y_true.astype(jnp.float32)
    prod = (yt * yp).sum(sum_axis)
    plus = (yt + yp).sum(sum_axis)
    iou = (2 + factor) * prod / (plus + factor * prod + eps)
    C = iou.shape[-1]
    w = jnp.ones((C,), jnp.float32) if weight is None else jnp.asarray(weight, jnp.float32)
    idx = np.ones(C, dtype=bool)
    idx[list(ignore_index)] = False
    x = iou[:, idx]
    w = w[idx]
    w = jnp.where(jnp.isnan(x), 0.0, 1.0) * w
    x = x * w / w.sum(-1, keepdims=True)
    red = {"none": (lambda v: v), "mean": jnp.mean, "sum": jnp.sum}[reduction]
    res = -red(x.sum(-1))
    return res + 1 if use_positive else res


if __name__ == "__main__":
    key = jax.random.PRNGKey(0)
    k1, k2, k3, k4 = jax.random.split(key, 4)

    # --- Case 1: standard aligned shapes, default args (dice / mean), jitted ---
    N, C, H, W = 2, 4, 16, 16
    logits = jax.random.normal(k1, (N, C, H, W), jnp.float32)
    y_pred = jax.nn.softmax(logits, axis=1)
    labels = jax.random.randint(k2, (N, H, W), 0, C)
    y_true = jax.nn.one_hot(labels, C, axis=1, dtype=jnp.float32)

    loss = jax.jit(soft_dice_loss)(y_pred, y_true)
    loss = jax.block_until_ready(loss)
    ref = soft_dice_loss_ref(y_pred, y_true)
    assert loss.shape == (), loss.shape
    assert bool(jnp.isfinite(loss)), float(loss)
    assert bool(jnp.allclose(loss, ref, atol=1e-5, rtol=1e-5)), (float(loss), float(ref))

    # --- Case 2: unaligned spatial size -> multi-block spatial grid + tail-lane masking,
    #             with class weights, ignore_index, iou mode and sum reduction ---
    N2, C2, H2, W2 = 2, 3, 23, 29
    logits2 = jax.random.normal(k3, (N2, C2, H2, W2), jnp.float32)
    y_pred2 = jax.nn.softmax(logits2, axis=1)
    labels2 = jax.random.randint(k4, (N2, H2, W2), 0, C2)
    y_true2 = jax.nn.one_hot(labels2, C2, axis=1, dtype=jnp.float32)
    wvec = jnp.asarray([0.2, 0.5, 0.3], jnp.float32)

    loss2 = soft_dice_loss(y_pred2, y_true2, weight=wvec, ignore_index=[0],
                           mode="iou", reduction="sum", block_bytes=4096)
    loss2 = jax.block_until_ready(loss2)
    ref2 = soft_dice_loss_ref(y_pred2, y_true2, weight=wvec, ignore_index=[0],
                              mode="iou", reduction="sum")
    assert bool(jnp.allclose(loss2, ref2, atol=1e-5, rtol=1e-5)), (float(loss2), float(ref2))

    print("KERNEL_OK")
</pallas_src>

<mosaic_0001>
module attributes {stable_mosaic.version = 11 : i64} {
  func.func @_dice_sums_kernel(%arg0: i32, %arg1: i32, %arg2: memref<8x256xf32, #tpu.memory_space<vmem>>, %arg3: memref<8x256xf32, #tpu.memory_space<vmem>>, %arg4: memref<8x1xf32, #tpu.memory_space<vmem>>, %arg5: memref<8x1xf32, #tpu.memory_space<vmem>>) attributes {dimension_semantics = [#tpu.dimension_semantics<parallel>, #tpu.dimension_semantics<arbitrary>], iteration_bounds = array<i64: 1, 1>, scalar_prefetch = 0 : i64, scratch_operands = 0 : i64, tpu.core_type = #tpu.core_type<tc>, window_params = [{transform_indices = @transform_0, window_bounds = array<i64: 8, 256>}, {transform_indices = @transform_1, window_bounds = array<i64: 8, 256>}, {transform_indices = @transform_2, window_bounds = array<i64: 8, 1>}, {transform_indices = @transform_3, window_bounds = array<i64: 8, 1>}]} {
    %c0_i32 = arith.constant 0 : i32
    %0 = arith.cmpi eq, %arg1, %c0_i32 : i32
    %1 = arith.extui %0 : i1 to i32
    %c0_i32_0 = arith.constant 0 : i32
    %2 = arith.cmpi ne, %1, %c0_i32_0 : i32
    scf.if %2 {
      %cst_13 = arith.constant 0.000000e+00 : f32
      %17 = vector.broadcast %cst_13 : f32 to vector<8x1xf32>
      %c0_14 = arith.constant 0 : index
      %c0_15 = arith.constant 0 : index
      %18 = vector.load %arg4[%c0_14, %c0_15] : memref<8x1xf32, #tpu.memory_space<vmem>>, vector<8x1xf32>
      tpu.vector_store %arg4[%c0_14, %c0_15], %17 {strides = array<i32>} : memref<8x1xf32, #tpu.memory_space<vmem>>, vector<8x1xf32>,
      %cst_16 = arith.constant 0.000000e+00 : f32
      %19 = vector.broadcast %cst_16 : f32 to vector<8x1xf32>
      %c0_17 = arith.constant 0 : index
      %c0_18 = arith.constant 0 : index
      %20 = vector.load %arg5[%c0_17, %c0_18] : memref<8x1xf32, #tpu.memory_space<vmem>>, vector<8x1xf32>
      tpu.vector_store %arg5[%c0_17, %c0_18], %19 {strides = array<i32>} : memref<8x1xf32, #tpu.memory_space<vmem>>, vector<8x1xf32>,
    } else {
    }
    %c0 = arith.constant 0 : index
    %c0_1 = arith.constant 0 : index
    %3 = vector.load %arg2[%c0, %c0_1] : memref<8x256xf32, #tpu.memory_space<vmem>>, vector<8x256xf32>
    %c0_2 = arith.constant 0 : index
    %c0_3 = arith.constant 0 : index
    %4 = vector.load %arg3[%c0_2, %c0_3] : memref<8x256xf32, #tpu.memory_space<vmem>>, vector<8x256xf32>
    %c0_4 = arith.constant 0 : index
    %c0_5 = arith.constant 0 : index
    %5 = vector.load %arg4[%c0_4, %c0_5] : memref<8x1xf32, #tpu.memory_space<vmem>>, vector<8x1xf32>
    %6 = arith.mulf %3, %4 : vector<8x256xf32>
    %cst = arith.constant dense<0.000000e+00> : vector<8xf32>
    %7 = vector.multi_reduction <add>, %6, %cst [1] : vector<8x256xf32> to vector<8xf32>
    %8 = vector.shape_cast %7 : vector<8xf32> to vector<8x1xf32>
    %9 = arith.addf %5, %8 : vector<8x1xf32>
    %c0_6 = arith.constant 0 : index
    %c0_7 = arith.constant 0 : index
    %10 = vector.load %arg4[%c0_6, %c0_7] : memref<8x1xf32, #tpu.memory_space<vmem>>, vector<8x1xf32>
    tpu.vector_store %arg4[%c0_6, %c0_7], %9 {strides = array<i32>} : memref<8x1xf32, #tpu.memory_space<vmem>>, vector<8x1xf32>,
    %c0_8 = arith.constant 0 : index
    %c0_9 = arith.constant 0 : index
    %11 = vector.load %arg5[%c0_8, %c0_9] : memref<8x1xf32, #tpu.memory_space<vmem>>, vector<8x1xf32>
    %12 = arith.addf %3, %4 : vector<8x256xf32>
    %cst_10 = arith.constant dense<0.000000e+00> : vector<8xf32>
    %13 = vector.multi_reduction <add>, %12, %cst_10 [1] : vector<8x256xf32> to vector<8xf32>
    %14 = vector.shape_cast %13 : vector<8xf32> to vector<8x1xf32>
    %15 = arith.addf %11, %14 : vector<8x1xf32>
    %c0_11 = arith.constant 0 : index
    %c0_12 = arith.constant 0 : index
    %16 = vector.load %arg5[%c0_11, %c0_12] : memref<8x1xf32, #tpu.memory_space<vmem>>, vector<8x1xf32>
    tpu.vector_store %arg5[%c0_11, %c0_12], %15 {strides = array<i32>} : memref<8x1xf32, #tpu.memory_space<vmem>>, vector<8x1xf32>,
    return
  }
  func.func @transform_0(%arg0: i32, %arg1: i32) -> (i32, i32) {
    %c0_i32 = arith.constant 0 : i32
    return %arg0, %arg1 : i32, i32
  }
  func.func @transform_1(%arg0: i32, %arg1: i32) -> (i32, i32) {
    %c0_i32 = arith.constant 0 : i32
    return %arg0, %arg1 : i32, i32
  }
  func.func @transform_2(%arg0: i32, %arg1: i32) -> (i32, i32) {
    %c0_i32 = arith.constant 0 : i32
    %c0_i32_0 = arith.constant 0 : i32
    return %arg0, %c0_i32 : i32, i32
  }
  func.func @transform_3(%arg0: i32, %arg1: i32) -> (i32, i32) {
    %c0_i32 = arith.constant 0 : i32
    %c0_i32_0 = arith.constant 0 : i32
    return %arg0, %c0_i32 : i32, i32
  }
}

</mosaic_0001>

<bundles_post_ra>
// kernel: soft_dice_loss.1
= control target key start
LH: loop header
LB: loop body
LE: loop exit
PB: predicated region body
PF: predicated region fallthrough
CT: control target
= control target key end

     0   :  { %vm17_vm0 = vcmask 7168   ;;  %v50_v3 = vmov 0.0   ;;  %s105_s0 = inlined_call_operand.vmem [shape: f32[8,256], index: 0, kind: input, shape index: {}]   ;;  %s106_s1 = inlined_call_operand.vmem [shape: f32[8,256], index: 1, kind: input, shape index: {}]   ;;  %s107_s2 = inlined_call_operand.vmem [shape: f32[8,1], index: 2, kind: output, shape index: {0}]   ;;  %s108_s3 = inlined_call_operand.vmem [shape: f32[8,1], index: 3, kind: output, shape index: {1}]  }
   0x1   :  { %v20_v0 = vld [vmem:[%s105_s0] sm:$0xff]  ;;  %v21_v1 = vld [vmem:[%s105_s0 + $0x8] sm:$0xff]  ;;  %18 = vst.msk [vmem:[%s107_s2] sm:$0xff] %vm17_vm0, %v50_v3  ;;  %19 = vst.msk [vmem:[%s108_s3] sm:$0xff] %vm17_vm0, %v50_v3 }
   0x2   :  { %v22_v2 = vld [vmem:[%s106_s1] sm:$0xff]  ;;  %v23_v4 = vld [vmem:[%s106_s1 + $0x8] sm:$0xff] }
   0x3   :  { %v25_v5 = vmul.f32 %v22_v2, %v20_v0  ;;  %v26_v6 = vmul.f32 %v23_v4, %v21_v1  ;;  %v34_v7 = vadd.f32 %v22_v2, %v20_v0  ;;  %v35_v8 = vadd.f32 %v23_v4, %v21_v1 }
   0x5   :  { %v27_v9 = vadd.f32 %v26_v6, %v25_v5  ;;  %v36_v10 = vadd.f32 %v35_v8, %v34_v7 }
   0x7   :  { %28 = vadd.xlane.f32.xlu0 %v27_v9 }
   0x8   :  { %v24_v11 = vld [vmem:[%s107_s2] sm:$0xff] }
   0x9   :  { %v33_v14 = vld [vmem:[%s108_s3] sm:$0xff] }
   0xb   :  { %37 = vadd.xlane.f32.xlu0 %v36_v10 }
  0x90   :  { %v29_v12 = vpop.xlane.xlu0 %28 }
  0x91   :  { %v30_v13 = vadd.f32 %v29_v12, %v24_v11 }
  0x93   :  { %32 = vst.msk [vmem:[%s107_s2] sm:$0xff] %vm17_vm0, %v30_v13 }
  0x94   :  { %v38_v15 = vpop.xlane.xlu0 %37 }
  0x95   :  { %v39_v16 = vadd.f32 %v38_v15, %v33_v14 }
  0x97   :  { %40 = vst.msk [vmem:[%s108_s3] sm:$0xff] %vm17_vm0, %v39_v16 }

</bundles_post_ra>
